<compile_context>
chip_gen: v6e
topology: v6e:2x2x1
jax: 0.10.0
libtpu: 0.0.40
codegen_flags: <defaults>
</compile_context>

<pallas_src>
import jax
import jax.numpy as jnp
from jax.experimental import pallas as pl
from jax.experimental.pallas import tpu as pltpu


def _round_up(a, m):
    return ((a + m - 1) // m) * m


def _cdiv(a, b):
    return -(-a // b)


def _vmem_capacity_bytes():
    """Physical VMEM per core for the current generation (fallback: 64 MiB)."""
    try:
        info = pltpu.get_tpu_info()
        for attr in ("vmem_capacity_bytes", "vmem_bytes", "vmem_size_bytes"):
            v = getattr(info, attr, None)
            if v:
                return int(v)
    except Exception:
        pass
    return 64 * 1024 * 1024  # conservative (v7x-sized)


def _make_kernel(num_chunks):
    """Kernel body; the (static) number of 128-lane chunks is closed over."""

    def kernel(logits_ref, targets_ref, weight_ref, out_ref):
        acc = None
        for c in range(num_chunks):
            sl = slice(c * 128, (c + 1) * 128)
            x = logits_ref[:, sl].astype(jnp.float32)    # (TB, 128)
            y = targets_ref[:, sl].astype(jnp.float32)   # (TB, 128)
            w = weight_ref[:, sl].astype(jnp.float32)    # (1, 128) -> broadcast

            # Numerically stable BCE-with-logits (== torch.nn.BCEWithLogitsLoss):
            #   max(x, 0) - x*y + log1p(exp(-|x|))
            per = jnp.maximum(x, 0.0) - x * y + jnp.log1p(jnp.exp(-jnp.abs(x)))
            term = per * w                               # padded cols: w == 0
            acc = term if acc is None else acc + term

        # Lane-dense (TB, 128) partial, stored straight to the output block.
        out_ref[...] = acc

    return kernel


def multi_bce_loss(logits, targets, class_labels_num, *, tb=512, tl=2048,
                   cast_inputs_to_bf16=False):
    """Pallas implementation of MultiBCELoss.forward.

    Args:
      logits:  [B, L] float array (f32 or bf16), L == sum(class_labels_num)
      targets: [B, L] numeric array (cast to float, like `.float()` in torch)
      class_labels_num: list[int] of group sizes along dim 1
      tb, tl: requested tile sizes (rounded to multiples of 8 / 128, shrunk if
              they would not fit the generation's VMEM budget)
      cast_inputs_to_bf16: optionally halve HBM traffic (loss accuracy ~1e-3)
    Returns:
      scalar float32 loss
    """
    B, L = logits.shape
    assert sum(class_labels_num) == L, "class_labels_num must sum to logits.shape[1]"
    G = len(class_labels_num)

    if not jnp.issubdtype(targets.dtype, jnp.floating):
        targets = targets.astype(jnp.float32)
    if cast_inputs_to_bf16:
        logits = logits.astype(jnp.bfloat16)
        targets = targets.astype(jnp.bfloat16)

    # Per-column weight 1/(B * n_g * G): mean within each group, mean over groups.
    n_per_col = jnp.concatenate(
        [jnp.full((n,), float(n), dtype=jnp.float32) for n in class_labels_num]
    )
    weight = (1.0 / (n_per_col * (float(B) * float(G))))[None, :]  # (1, L)

    # ---- Tile selection (validated + generation-aware) -----------------------
    tb = max(8, _round_up(int(tb), 8))
    tl = max(128, _round_up(int(tl), 128))
    Bp8 = _round_up(B, 8)
    Lp128 = _round_up(L, 128)
    TB = min(tb, Bp8)
    TL = min(tl, Lp128)

    isx = jnp.dtype(logits.dtype).itemsize
    isy = jnp.dtype(targets.dtype).itemsize

    def _live_bytes(tb_, tl_):
        return (2 * tb_ * tl_ * (isx + isy)   # double-buffered logits + targets
                + 2 * tl_ * 4                 # double-buffered weight row
                + 2 * tb_ * 128 * 4           # double-buffered output block
                + 6 * tb_ * 128 * 4           # per-chunk compute temporaries
                + (2 << 20))                  # misc / internal scratch headroom

    cap = int(0.75 * _vmem_capacity_bytes())  # ~48 MiB on v7x, ~96 MiB on v5e/v6e
    while int(1.3 * _live_bytes(TB, TL)) > cap and TL > 128:
        TL = max(128, _round_up(TL // 2, 128))
    while int(1.3 * _live_bytes(TB, TL)) > cap and TB > 8:
        TB = max(8, _round_up(TB // 2, 8))

    # Rebalance tiles to minimize padding (never grows the tile).
    nB = _cdiv(Bp8, TB)
    nL = _cdiv(Lp128, TL)
    TB = _round_up(_cdiv(Bp8, nB), 8)
    TL = _round_up(_cdiv(Lp128, nL), 128)
    Bp, Lp = nB * TB, nL * TL

    vmem_limit = int(min(cap, max(32 << 20, int(1.3 * _live_bytes(TB, TL)))))

    # Finite zero padding: padded columns carry zero weight (contribute 0),
    # padded rows are dropped by the JAX-side [:B] slice below.
    logits_p = jnp.pad(logits, ((0, Bp - B), (0, Lp - L)))
    targets_p = jnp.pad(targets, ((0, Bp - B), (0, Lp - L)))
    weight_p = jnp.pad(weight, ((0, 0), (0, Lp - L)))

    kernel = _make_kernel(TL // 128)
    partials = pl.pallas_call(
        kernel,
        out_shape=jax.ShapeDtypeStruct((Bp, nL * 128), jnp.float32),
        grid_spec=pltpu.PrefetchScalarGridSpec(
            num_scalar_prefetch=0,
            grid=(nB, nL),
            in_specs=[
                pl.BlockSpec((TB, TL), lambda i, j: (i, j)),
                pl.BlockSpec((TB, TL), lambda i, j: (i, j)),
                pl.BlockSpec((1, TL), lambda i, j: (0, j)),   # tiny weight row
            ],
            out_specs=pl.BlockSpec((TB, 128), lambda i, j: (i, j)),
        ),
        compiler_params=pltpu.CompilerParams(
            dimension_semantics=("parallel", "parallel"),
            vmem_limit_bytes=vmem_limit,
        ),
    )(logits_p, targets_p, weight_p)

    # Tiny (Bp, nL*128) partials: drop padded rows, finish the reduction in JAX.
    return jnp.sum(partials[:B, :])


def _reference_multi_bce(logits, targets, class_labels_num):
    # Pure-JAX reference mirroring the PyTorch loop, for sanity checking.
    x = logits.astype(jnp.float32)
    y = targets.astype(jnp.float32)
    loss = 0.0
    start = 0
    for n in class_labels_num:
        xc = x[:, start:start + n]
        yc = y[:, start:start + n]
        per = jnp.maximum(xc, 0.0) - xc * yc + jnp.log1p(jnp.exp(-jnp.abs(xc)))
        loss = loss + jnp.mean(per)
        start += n
    return loss / len(class_labels_num)


if __name__ == "__main__":
    key = jax.random.PRNGKey(0)
    k1, k2, k3, k4, k5, k6 = jax.random.split(key, 6)

    # Test 1: tiny shapes matching the module spec (single tile after padding).
    class_labels_num = [3, 2, 3]
    B = 2
    L = sum(class_labels_num)
    logits = jax.random.normal(k1, (B, L), dtype=jnp.float32)
    targets = (jax.random.uniform(k2, (B, L)) > 0.5).astype(jnp.float32)
    loss = jax.block_until_ready(multi_bce_loss(logits, targets, class_labels_num))
    ref = _reference_multi_bce(logits, targets, class_labels_num)
    assert jnp.allclose(loss, ref, atol=1e-5, rtol=1e-5), (loss, ref)

    # Test 2: force a multi-tile grid (small tiles) with row/col padding and
    # bf16 inputs, exercising the per-(i,j) partials and padding handling.
    class_labels_num2 = [130, 50, 20]
    B2 = 10
    L2 = sum(class_labels_num2)
    logits2 = jax.random.normal(k3, (B2, L2), dtype=jnp.bfloat16)
    targets2 = (jax.random.uniform(k4, (B2, L2)) > 0.5).astype(jnp.bfloat16)
    loss2 = jax.block_until_ready(
        multi_bce_loss(logits2, targets2, class_labels_num2, tb=8, tl=128))
    ref2 = _reference_multi_bce(logits2, targets2, class_labels_num2)
    assert jnp.allclose(loss2, ref2, atol=2e-3, rtol=2e-3), (loss2, ref2)

    # Test 3: default (large) tile path with clamping + column padding, f32.
    class_labels_num3 = [500, 300, 200]
    B3 = 24
    L3 = sum(class_labels_num3)
    logits3 = jax.random.normal(k5, (B3, L3), dtype=jnp.float32)
    targets3 = (jax.random.uniform(k6, (B3, L3)) > 0.5).astype(jnp.float32)
    loss3 = jax.block_until_ready(multi_bce_loss(logits3, targets3, class_labels_num3))
    ref3 = _reference_multi_bce(logits3, targets3, class_labels_num3)
    assert jnp.allclose(loss3, ref3, atol=1e-5, rtol=1e-5), (loss3, ref3)

    print("KERNEL_OK")
</pallas_src>

<mosaic_0001>
module attributes {stable_mosaic.version = 11 : i64} {
  func.func @kernel(%arg0: i32, %arg1: i32, %arg2: memref<8x128xf32, #tpu.memory_space<vmem>>, %arg3: memref<8x128xf32, #tpu.memory_space<vmem>>, %arg4: memref<1x128xf32, #tpu.memory_space<vmem>>, %arg5: memref<8x128xf32, #tpu.memory_space<vmem>>) attributes {dimension_semantics = [#tpu.dimension_semantics<parallel>, #tpu.dimension_semantics<parallel>], iteration_bounds = array<i64: 1, 1>, scalar_prefetch = 0 : i64, scratch_operands = 0 : i64, tpu.core_type = #tpu.core_type<tc>, window_params = [{transform_indices = @transform_0, window_bounds = array<i64: 8, 128>}, {transform_indices = @transform_1, window_bounds = array<i64: 8, 128>}, {transform_indices = @transform_2, window_bounds = array<i64: 1, 128>}, {transform_indices = @transform_3, window_bounds = array<i64: 8, 128>}]} {
    %c0 = arith.constant 0 : index
    %c0_0 = arith.constant 0 : index
    %0 = vector.load %arg2[%c0, %c0_0] : memref<8x128xf32, #tpu.memory_space<vmem>>, vector<8x128xf32>
    %c0_1 = arith.constant 0 : index
    %c0_2 = arith.constant 0 : index
    %1 = vector.load %arg3[%c0_1, %c0_2] : memref<8x128xf32, #tpu.memory_space<vmem>>, vector<8x128xf32>
    %c0_3 = arith.constant 0 : index
    %c0_4 = arith.constant 0 : index
    %2 = vector.load %arg4[%c0_3, %c0_4] : memref<1x128xf32, #tpu.memory_space<vmem>>, vector<1x128xf32>
    %cst = arith.constant 0.000000e+00 : f32
    %3 = vector.broadcast %cst : f32 to vector<8x128xf32>
    %4 = arith.maximumf %0, %3 : vector<8x128xf32>
    %5 = arith.mulf %0, %1 : vector<8x128xf32>
    %6 = arith.subf %4, %5 : vector<8x128xf32>
    %7 = math.absf %0 : vector<8x128xf32>
    %cst_5 = arith.constant 0.000000e+00 : f32
    %8 = vector.broadcast %cst_5 : f32 to vector<8x128xf32>
    %9 = arith.subf %8, %7 : vector<8x128xf32>
    %10 = math.exp %9 : vector<8x128xf32>
    %11 = math.log1p %10 : vector<8x128xf32>
    %12 = arith.addf %6, %11 : vector<8x128xf32>
    %13 = vector.broadcast %2 : vector<1x128xf32> to vector<8x128xf32>
    %14 = arith.mulf %12, %13 : vector<8x128xf32>
    %c0_6 = arith.constant 0 : index
    %c0_7 = arith.constant 0 : index
    %15 = vector.load %arg5[%c0_6, %c0_7] : memref<8x128xf32, #tpu.memory_space<vmem>>, vector<8x128xf32>
    tpu.vector_store %arg5[%c0_6, %c0_7], %14 {strides = array<i32>} : memref<8x128xf32, #tpu.memory_space<vmem>>, vector<8x128xf32>,
    return
  }
  func.func @transform_0(%arg0: i32, %arg1: i32) -> (i32, i32) {
    %c0_i32 = arith.constant 0 : i32
    return %arg0, %arg1 : i32, i32
  }
  func.func @transform_1(%arg0: i32, %arg1: i32) -> (i32, i32) {
    %c0_i32 = arith.constant 0 : i32
    return %arg0, %arg1 : i32, i32
  }
  func.func @transform_2(%arg0: i32, %arg1: i32) -> (i32, i32) {
    %c0_i32 = arith.constant 0 : i32
    %c0_i32_0 = arith.constant 0 : i32
    return %c0_i32, %arg1 : i32, i32
  }
  func.func @transform_3(%arg0: i32, %arg1: i32) -> (i32, i32) {
    %c0_i32 = arith.constant 0 : i32
    return %arg0, %arg1 : i32, i32
  }
}

</mosaic_0001>

<bundles_post_ra>
// kernel: tpu_custom_call.1
= control target key start
LH: loop header
LB: loop body
LE: loop exit
PB: predicated region body
PF: predicated region fallthrough
CT: control target
= control target key end

     0   :  { %8 = vsyncpa [#allocation3], 0  ;;  %s192_s0 = inlined_call_operand.hbm [shape: f32[8,128], index: 0, kind: input, shape index: {}]   ;;  %s193_s1 = inlined_call_operand.hbm [shape: f32[8,128], index: 1, kind: input, shape index: {}]   ;;  %s194_s2 = inlined_call_operand.vmem [shape: f32[1,128], index: 2, kind: input, shape index: {}]   ;;  %s195_s3 = inlined_call_operand.hbm [shape: f32[8,128], index: 3, kind: output, shape index: {}]  }
   0x1   :  { %9 = vsyncpa [#allocation6], 0 }
   0x2   :  { %10 = vsyncpa [#allocation4], 0  ;;  %s157_s12 = smov [#allocation2]   ;;  %s158_s14 = smov [#allocation5]  }
   0x3   :  { %s17_s13 = sshll.u32 %s157_s12, 4  ;;  %s27_s15 = sshll.u32 %s158_s14, 4  ;;  %s18_s13 = int_to_ptr.vmem [resolvable:$true] %s17_s13  ;;  %s28_s15 = int_to_ptr.vmem [resolvable:$true] %s27_s15 }
   0x4   :  { %s99_s16 = scalar_lea.vmem %s18_s13, 128  ;;  %p104_p1 = scmp.lt.s32.totalorder %s18_s13, %s18_s13 }
   0x5   :  { %p100_p0 = scmp.ne.s32.totalorder %s18_s13, %s99_s16  ;;  %p105_p2 = scmp.lt.s32.totalorder %s99_s16, %s99_s16 }
   0x7   :  { %p106_p3 = por %p105_p2, %p104_p1 }
   0x9   :  { %p107_p4 = pnand %p106_p3, %p100_p0 }
   0xb   :  { %110 = shalt.err (!%p107_p4)
}
   0xc   :  { %20 = dma.hbm_to_vmem [thread:$0]  %s192_s0, 128, %s18_s13, [#allocation3]  }
   0xd   :  { %s119_s19 = scalar_lea.vmem %s28_s15, 128  ;;  %p124_p6 = scmp.lt.s32.totalorder %s28_s15, %s28_s15 }
   0xe   :  { %p120_p5 = scmp.ne.s32.totalorder %s28_s15, %s119_s19  ;;  %p125_p7 = scmp.lt.s32.totalorder %s119_s19, %s119_s19 }
  0x10   :  { %p126_p8 = por %p125_p7, %p124_p6 }
  0x12   :  { %p127_p9 = pnand %p126_p8, %p120_p5 }
  0x14   :  { %130 = shalt.err (!%p127_p9)
}
  0x15   :  { %30 = dma.hbm_to_vmem [thread:$0]  %s193_s1, 128, %s28_s15, [#allocation6]  }
  0x16   :  { %151 = dma.done.wait [#allocation3], 128  }
  0x17   :  { %152 = vsyncadd [#allocation3], 4294967168 }
  0x18   :  { %153 = dma.done.wait [#allocation6], 128  }
  0x19   :  { %154 = vsyncadd [#allocation6], 4294967168  ;;  %v39_v0 = vld [vmem:[#allocation2] sm:$0xff]  ;;  %v40_v7 = vld [vmem:[#allocation5] sm:$0xff]  ;;  %s159_s22 = smov [#allocation7]  }
  0x1a   :  { %v45_v1 = vand.u32 2147483647, %v39_v0  ;;  %v42_v9 = vmax.f32 %v39_v0, 0.0  ;;  %v43_v10 = vmul.f32 %v40_v7, %v39_v0  ;;  %v83_v16 = vld [vmem:[%s194_s2] ss:$0 sm:$0xff]  ;;  %s73_s23 = sshll.u32 %s159_s22, 4  ;;  %s74_s23 = int_to_ptr.vmem [resolvable:$true] %s73_s23 }
  0x1b   :  { %s131_s24 = scalar_lea.vmem %s74_s23, 128  ;;  %p136_p11 = scmp.lt.s32.totalorder %s74_s23, %s74_s23 }
  0x1c   :  { %v46_v2 = vsub.f32 0.0, %v45_v1  ;;  %v44_v14 = vsub.f32 %v42_v9, %v43_v10  ;;  %p132_p10 = scmp.ne.s32.totalorder %s74_s23, %s131_s24  ;;  %p137_p12 = scmp.lt.s32.totalorder %s131_s24, %s131_s24 }
  0x1e   :  { %v47_v3 = vmul.f32 1.442695, %v46_v2  ;;  %p138_p13 = por %p137_p12, %p136_p11 }
  0x20   :  { %87 = vpow2.f32 %v47_v3  ;;  %p139_p0 = pnand %p138_p13, %p132_p10 }
  0x2d   :  { %v88_v4 = vpop.eup %87 }
  0x2e   :  { %v49_v5 = vadd.f32 1.0, %v88_v4  ;;  %v52_v6 = vmul.f32 -0.5, %v88_v4  ;;  %v55_v11 = vand.u32 2147483647, %v88_v4 }
  0x30   :  { %89 = vlog2.f32 %v49_v5  ;;  %v53_v8 = vadd.f32 1.0, %v52_v6  ;;  %vm56_vm0 = vcmp.lt.f32.partialorder %v55_v11, 0.0004427343 }
  0x32   :  { %v54_v12 = vmul.f32 %v88_v4, %v53_v8 }
  0x3d   :  { %v90_v13 = vpop.eup %89 }
  0x3e   :  { %v51_v15 = vmul.f32 0.6931472, %v90_v13 }
  0x40   :  { %v57_v17 = vsel %vm56_vm0, %v54_v12, %v51_v15 }
  0x41   :  { %v58_v18 = vadd.f32 %v57_v17, %v44_v14 }
  0x43   :  { %v65_v19 = vmul.f32 %v83_v16, %v58_v18 }
  0x45   :  { %66 = vst [vmem:[#allocation7] sm:$0xff] %v65_v19 }
  0x46   :  { %142 = shalt.err (!%p139_p0)
}
  0x47   :  { %76 = dma.vmem_to_hbm [thread:$0]  %s74_s23, 128, %s195_s3, [#allocation4]  }
  0x48   :  { %155 = dma.done.wait [#allocation4], 128  }
  0x49   :  { %156 = vsyncadd [#allocation4], 4294967168 }
  0x4a   :  { %80 = vsyncpa [#allocation3], 1 }
  0x4b   :  { %81 = vsyncpa [#allocation6], 1 }
  0x4c   :  { %82 = vsyncpa [#allocation4], 1 }

</bundles_post_ra>
